<compile_context>
chip_gen: v5e
topology: v5e:2x2
jax: 0.10.0
libtpu: 0.0.40
codegen_flags: <defaults>
</compile_context>

<pallas_src>
import math

import jax
import jax.numpy as jnp
from jax.experimental import pallas as pl
from jax.experimental.pallas import tpu as pltpu


def _round_up(v, m):
    return (v + m - 1) // m * m


def _vmem_budget():
    """Generation-aware VMEM sizing: (vmem_limit_bytes, working-set budget)."""
    cap = None
    try:
        cap = getattr(pltpu.get_tpu_info(), "vmem_capacity_bytes", None)
    except Exception:
        cap = None
    if not cap:
        cap = 64 * 1024 * 1024                      # conservative: v7x per-TC VMEM
    limit = min(int(cap) * 3 // 4, 100 * 1024 * 1024)
    limit = max(limit, 32 * 1024 * 1024)
    budget = limit * 3 // 4
    return limit, budget


def _auto_tiles(Np, Fp, Hp, Foutp, budget_bytes, tile_n=None, tile_k=None):
    """Pick (tile_n, tile_k). tile_n: multiple of 32 dividing Np, largest fitting the
    VMEM budget, capped so the grid has >= 2 row tiles. tile_k: multiple of 256
    dividing Np (Np itself is a multiple of 256)."""
    if tile_k is None:
        tile_k = 256
        for cand in (1024, 512, 256):
            if Np % cand == 0:
                tile_k = cand
                break

    if tile_n is None:
        # Resident operands (counted double-buffered to stay conservative).
        resident = 2 * (Fp * Hp + Hp * Foutp) * 2       # bf16 weights
        resident += 2 * (Hp + Foutp) * 4                # f32 biases
        resident += 2 * tile_k * Fp * 2                 # bf16 x k-tile (double-buffered)
        tile_n = 32
        for cand in (1024, 512, 256, 128, 64, 32):
            if cand > Np or Np % cand != 0:
                continue
            if cand > 32 and Np // cand < 2:
                continue                                # keep >= 2 row tiles (v7x megacore)
            need = resident
            need += 2 * cand * tile_k * 1               # int8 A block (double-buffered)
            need += 2 * cand * Fp * 2                   # bf16 x row block (double-buffered)
            need += 2 * cand * Foutp * 4                # f32 output block (double-buffered)
            need += cand * Fp * 4                       # f32 accumulator scratch
            need += cand * (Fp + Hp + Foutp) * 4        # in-kernel temporaries (h, h1, y)
            need += cand * tile_k * 2                   # bf16 upcast of the A block
            if need <= budget_bytes:
                tile_n = cand
                break
    return tile_n, tile_k


def gin_kernel(eps_ref, a_ref, xk_ref, xr_ref, w1_ref, b1_ref, w2_ref, b2_ref,
               o_ref, acc_ref):
    k = pl.program_id(1)

    # Init the f32 aggregation accumulator at the first k-tile of each row tile.
    @pl.when(k == 0)
    def _():
        acc_ref[...] = jnp.zeros_like(acc_ref)

    # Neighbor aggregation partial sum: int8 counts upcast to bf16 (VPU cast) and fed
    # to the MXU against the bf16 x k-tile, accumulating in f32.
    a_bf16 = a_ref[...].astype(jnp.bfloat16)
    acc_ref[...] += jnp.dot(a_bf16, xk_ref[...], preferred_element_type=jnp.float32)

    # Finalize on the last k-tile: self term + MLP (bf16 matmuls, f32 accumulate).
    @pl.when(k == pl.num_programs(1) - 1)
    def _():
        one_plus_eps = 1.0 + eps_ref[0]                         # SMEM scalar, read once
        h = one_plus_eps * xr_ref[...].astype(jnp.float32) + acc_ref[...]
        h1 = jnp.dot(h.astype(jnp.bfloat16), w1_ref[...],
                     preferred_element_type=jnp.float32) + b1_ref[...]
        h1 = jnp.maximum(h1, 0.0)
        y = jnp.dot(h1.astype(jnp.bfloat16), w2_ref[...],
                    preferred_element_type=jnp.float32) + b2_ref[...]
        o_ref[...] = y.astype(o_ref.dtype)


def gin_conv_pallas(x, edge_index, eps, w1, b1, w2, b2, *, tile_n=None, tile_k=None):
    """GINConv forward. x: (N, F) float32, edge_index: (2, E) int32."""
    N, F = x.shape
    H = w1.shape[1]
    Fout = w2.shape[1]

    # Pad feature dims to the 128-lane width so matmuls / stores are lane-dense.
    Fp, Hp, Foutp = (_round_up(d, 128) for d in (F, H, Fout))

    # Node-dimension padding: multiple of 256 (and of any user-requested tiles).
    mult = 256
    if tile_n is not None:
        assert tile_n % 32 == 0 and tile_n >= 32, "tile_n must be a multiple of 32"
        mult = math.lcm(mult, tile_n)
    if tile_k is not None:
        assert tile_k % 128 == 0, "tile_k must be a multiple of 128"
        mult = math.lcm(mult, tile_k)
    Np = _round_up(max(N, 1), mult)

    vmem_limit, budget = _vmem_budget()
    tile_n, tile_k = _auto_tiles(Np, Fp, Hp, Foutp, budget, tile_n=tile_n, tile_k=tile_k)

    row, col = edge_index[0], edge_index[1]

    # Dense adjacency-count matrix built directly in its final narrow dtype:
    # A[r, c] = #edges (r <- c). A @ x reproduces scatter_add(x[col], row) exactly.
    # int8 counts are exact for edge multiplicities <= 127.
    ones = jnp.ones(row.shape, dtype=jnp.int8)
    a = jnp.zeros((Np, Np), jnp.int8).at[row, col].add(ones)

    x_bf16 = jnp.pad(x, ((0, Np - N), (0, Fp - F))).astype(jnp.bfloat16)
    w1p = jnp.pad(w1, ((0, Fp - F), (0, Hp - H))).astype(jnp.bfloat16)
    w2p = jnp.pad(w2, ((0, Hp - H), (0, Foutp - Fout))).astype(jnp.bfloat16)
    b1p = jnp.pad(b1.reshape(1, -1).astype(jnp.float32), ((0, 0), (0, Hp - H)))
    b2p = jnp.pad(b2.reshape(1, -1).astype(jnp.float32), ((0, 0), (0, Foutp - Fout)))
    eps_arr = jnp.full((1,), eps, dtype=jnp.float32)

    grid = (Np // tile_n, Np // tile_k)

    out_padded = pl.pallas_call(
        gin_kernel,
        out_shape=jax.ShapeDtypeStruct((Np, Foutp), x.dtype),
        grid=grid,
        in_specs=[
            pl.BlockSpec(memory_space=pltpu.SMEM),                  # eps (1,) scalar
            pl.BlockSpec((tile_n, tile_k), lambda i, k: (i, k)),    # A block, int8
            pl.BlockSpec((tile_k, Fp), lambda i, k: (k, 0)),        # x k-tile, bf16
            pl.BlockSpec((tile_n, Fp), lambda i, k: (i, 0)),        # x row tile, bf16
            pl.BlockSpec((Fp, Hp), lambda i, k: (0, 0)),            # w1 bf16 (resident)
            pl.BlockSpec((1, Hp), lambda i, k: (0, 0)),             # b1 f32 (resident)
            pl.BlockSpec((Hp, Foutp), lambda i, k: (0, 0)),         # w2 bf16 (resident)
            pl.BlockSpec((1, Foutp), lambda i, k: (0, 0)),          # b2 f32 (resident)
        ],
        out_specs=pl.BlockSpec((tile_n, Foutp), lambda i, k: (i, 0)),
        scratch_shapes=[pltpu.VMEM((tile_n, Fp), jnp.float32)],     # aggregation accumulator
        compiler_params=pltpu.CompilerParams(
            dimension_semantics=("parallel", "arbitrary"),
            vmem_limit_bytes=vmem_limit,
        ),
    )(eps_arr, a, x_bf16, x_bf16, w1p, b1p, w2p, b2p)

    return out_padded[:N, :Fout]


def gin_conv_ref(x, edge_index, eps, w1, b1, w2, b2):
    """Plain-JAX f32 reference matching the PyTorch semantics."""
    row, col = edge_index[0], edge_index[1]
    out = jnp.zeros_like(x).at[row].add(x[col])          # scatter_add(x[col], row)
    out = (1.0 + eps) * x + out
    out = jnp.maximum(out @ w1 + b1.reshape(1, -1), 0.0)
    out = out @ w2 + b2.reshape(1, -1)
    return out


if __name__ == "__main__":
    # Small deterministic problem: N nodes, F in-features, H hidden, Fout out-features, E edges.
    N, F, H, Fout, E = 48, 8, 32, 8, 96
    eps = 0.1

    key = jax.random.PRNGKey(0)
    kx, krow, kcol, kw1, kb1, kw2, kb2 = jax.random.split(key, 7)

    x = jax.random.normal(kx, (N, F), dtype=jnp.float32)
    row = jax.random.randint(krow, (E,), 0, N, dtype=jnp.int32)
    col = jax.random.randint(kcol, (E,), 0, N, dtype=jnp.int32)
    edge_index = jnp.stack([row, col], axis=0)           # (2, E)

    # nn = Sequential(Linear(F, H), ReLU(), Linear(H, Fout)), deterministic init.
    w1 = jax.random.normal(kw1, (F, H), dtype=jnp.float32) * 0.1
    b1 = jax.random.normal(kb1, (H,), dtype=jnp.float32) * 0.1
    w2 = jax.random.normal(kw2, (H, Fout), dtype=jnp.float32) * 0.1
    b2 = jax.random.normal(kb2, (Fout,), dtype=jnp.float32) * 0.1

    ref = gin_conv_ref(x, edge_index, eps, w1, b1, w2, b2)

    # Auto-sized tiles (Np=256 -> 2 row tiles x 1 k tile).
    out_auto = jax.block_until_ready(
        gin_conv_pallas(x, edge_index, eps, w1, b1, w2, b2))
    # Explicit small tiles to exercise the multi-step K accumulation (4 row x 2 k tiles).
    out_tiled = jax.block_until_ready(
        gin_conv_pallas(x, edge_index, eps, w1, b1, w2, b2, tile_n=64, tile_k=128))

    assert out_auto.shape == (N, Fout)
    assert out_tiled.shape == (N, Fout)
    # Aggregation and MLP operands run in bf16 (f32 accumulate); tolerance reflects
    # that ~1e-2-relative drift bound vs. the pure-f32 reference.
    assert jnp.allclose(out_auto, ref, rtol=5e-2, atol=5e-2), "auto-tile mismatch vs reference"
    assert jnp.allclose(out_tiled, ref, rtol=5e-2, atol=5e-2), "tiled mismatch vs reference"

    print("KERNEL_OK")
</pallas_src>

<mosaic_0001>
module attributes {stable_mosaic.version = 11 : i64} {
  func.func @gin_kernel(%arg0: i32, %arg1: i32, %arg2: memref<1xf32, #tpu.memory_space<smem>>, %arg3: memref<128x256xi8, #tpu.memory_space<vmem>>, %arg4: memref<256x128xbf16, #tpu.memory_space<vmem>>, %arg5: memref<128x128xbf16, #tpu.memory_space<vmem>>, %arg6: memref<128x128xbf16, #tpu.memory_space<vmem>>, %arg7: memref<1x128xf32, #tpu.memory_space<vmem>>, %arg8: memref<128x128xbf16, #tpu.memory_space<vmem>>, %arg9: memref<1x128xf32, #tpu.memory_space<vmem>>, %arg10: memref<128x128xf32, #tpu.memory_space<vmem>>, %arg11: memref<128x128xf32, #tpu.memory_space<vmem>>) attributes {dimension_semantics = [#tpu.dimension_semantics<parallel>, #tpu.dimension_semantics<arbitrary>], iteration_bounds = array<i64: 2, 1>, scalar_prefetch = 0 : i64, scratch_operands = 1 : i64, tpu.core_type = #tpu.core_type<tc>, window_params = [{transform_indices = @transform_0, window_bounds = array<i64: 1>}, {transform_indices = @transform_1, window_bounds = array<i64: 128, 256>}, {transform_indices = @transform_2, window_bounds = array<i64: 256, 128>}, {transform_indices = @transform_3, window_bounds = array<i64: 128, 128>}, {pipeline_mode = #tpu.pipeline_mode<synchronous>, transform_indices = @transform_4, window_bounds = array<i64: 128, 128>}, {pipeline_mode = #tpu.pipeline_mode<synchronous>, transform_indices = @transform_5, window_bounds = array<i64: 1, 128>}, {pipeline_mode = #tpu.pipeline_mode<synchronous>, transform_indices = @transform_6, window_bounds = array<i64: 128, 128>}, {pipeline_mode = #tpu.pipeline_mode<synchronous>, transform_indices = @transform_7, window_bounds = array<i64: 1, 128>}, {transform_indices = @transform_8, window_bounds = array<i64: 128, 128>}]} {
    %c0_i32 = arith.constant 0 : i32
    %0 = arith.cmpi eq, %arg1, %c0_i32 : i32
    %1 = arith.extui %0 : i1 to i32
    %c0_i32_0 = arith.constant 0 : i32
    %2 = arith.cmpi ne, %1, %c0_i32_0 : i32
    scf.if %2 {
      %cst_10 = arith.constant 0.000000e+00 : f32
      %13 = vector.broadcast %cst_10 : f32 to vector<128x128xf32>
      %c0_11 = arith.constant 0 : index
      %c0_12 = arith.constant 0 : index
      %14 = vector.load %arg11[%c0_11, %c0_12] : memref<128x128xf32, #tpu.memory_space<vmem>>, vector<128x128xf32>
      tpu.vector_store %arg11[%c0_11, %c0_12], %13 {strides = array<i32>} : memref<128x128xf32, #tpu.memory_space<vmem>>, vector<128x128xf32>,
    } else {
    }
    %c0 = arith.constant 0 : index
    %c0_1 = arith.constant 0 : index
    %3 = vector.load %arg3[%c0, %c0_1] : memref<128x256xi8, #tpu.memory_space<vmem>>, vector<128x256xi8>
    %4 = arith.sitofp %3 : vector<128x256xi8> to vector<128x256xbf16>
    %c0_2 = arith.constant 0 : index
    %c0_3 = arith.constant 0 : index
    %5 = vector.load %arg11[%c0_2, %c0_3] : memref<128x128xf32, #tpu.memory_space<vmem>>, vector<128x128xf32>
    %c0_4 = arith.constant 0 : index
    %c0_5 = arith.constant 0 : index
    %6 = vector.load %arg4[%c0_4, %c0_5] : memref<256x128xbf16, #tpu.memory_space<vmem>>, vector<256x128xbf16>
    %cst = arith.constant dense<0.000000e+00> : vector<128x128xf32>
    %7 = tpu.matmul %4, %6, %cst {dimension_numbers = #tpu.dot_dimension_numbers<[1], [0], [0], [1], [0, 0, 1, 1], [], []>} : vector<128x256xbf16>, vector<256x128xbf16>, vector<128x128xf32> -> vector<128x128xf32>
    %8 = arith.addf %5, %7 : vector<128x128xf32>
    %c0_6 = arith.constant 0 : index
    %c0_7 = arith.constant 0 : index
    %9 = vector.load %arg11[%c0_6, %c0_7] : memref<128x128xf32, #tpu.memory_space<vmem>>, vector<128x128xf32>
    tpu.vector_store %arg11[%c0_6, %c0_7], %8 {strides = array<i32>} : memref<128x128xf32, #tpu.memory_space<vmem>>, vector<128x128xf32>,
    %c0_i32_8 = arith.constant 0 : i32
    %10 = arith.cmpi eq, %arg1, %c0_i32_8 : i32
    %11 = arith.extui %10 : i1 to i32
    %c0_i32_9 = arith.constant 0 : i32
    %12 = arith.cmpi ne, %11, %c0_i32_9 : i32
    scf.if %12 {
      %c0_10 = arith.constant 0 : index
      %13 = memref.load %arg2[%c0_10] : memref<1xf32, #tpu.memory_space<smem>>
      %cst_11 = arith.constant 1.000000e+00 : f32
      %14 = arith.addf %cst_11, %13 : f32
      %c0_12 = arith.constant 0 : index
      %c0_13 = arith.constant 0 : index
      %15 = vector.load %arg5[%c0_12, %c0_13] : memref<128x128xbf16, #tpu.memory_space<vmem>>, vector<128x128xbf16>
      %16 = arith.extf %15 : vector<128x128xbf16> to vector<128x128xf32>
      %17 = vector.broadcast %14 : f32 to vector<128x128xf32>
      %18 = arith.mulf %17, %16 : vector<128x128xf32>
      %c0_14 = arith.constant 0 : index
      %c0_15 = arith.constant 0 : index
      %19 = vector.load %arg11[%c0_14, %c0_15] : memref<128x128xf32, #tpu.memory_space<vmem>>, vector<128x128xf32>
      %20 = arith.addf %18, %19 : vector<128x128xf32>
      %21 = arith.truncf %20 : vector<128x128xf32> to vector<128x128xbf16>
      %c0_16 = arith.constant 0 : index
      %c0_17 = arith.constant 0 : index
      %22 = vector.load %arg6[%c0_16, %c0_17] : memref<128x128xbf16, #tpu.memory_space<vmem>>, vector<128x128xbf16>
      %cst_18 = arith.constant dense<0.000000e+00> : vector<128x128xf32>
      %23 = tpu.matmul %21, %22, %cst_18 {dimension_numbers = #tpu.dot_dimension_numbers<[1], [0], [0], [1], [0, 0, 1, 1], [], []>} : vector<128x128xbf16>, vector<128x128xbf16>, vector<128x128xf32> -> vector<128x128xf32>
      %c0_19 = arith.constant 0 : index
      %c0_20 = arith.constant 0 : index
      %24 = vector.load %arg7[%c0_19, %c0_20] : memref<1x128xf32, #tpu.memory_space<vmem>>, vector<1x128xf32>
      %25 = vector.broadcast %24 : vector<1x128xf32> to vector<128x128xf32>
      %26 = arith.addf %23, %25 : vector<128x128xf32>
      %cst_21 = arith.constant 0.000000e+00 : f32
      %27 = vector.broadcast %cst_21 : f32 to vector<128x128xf32>
      %28 = arith.maximumf %26, %27 : vector<128x128xf32>
      %29 = arith.truncf %28 : vector<128x128xf32> to vector<128x128xbf16>
      %c0_22 = arith.constant 0 : index
      %c0_23 = arith.constant 0 : index
      %30 = vector.load %arg8[%c0_22, %c0_23] : memref<128x128xbf16, #tpu.memory_space<vmem>>, vector<128x128xbf16>
      %cst_24 = arith.constant dense<0.000000e+00> : vector<128x128xf32>
      %31 = tpu.matmul %29, %30, %cst_24 {dimension_numbers = #tpu.dot_dimension_numbers<[1], [0], [0], [1], [0, 0, 1, 1], [], []>} : vector<128x128xbf16>, vector<128x128xbf16>, vector<128x128xf32> -> vector<128x128xf32>
      %c0_25 = arith.constant 0 : index
      %c0_26 = arith.constant 0 : index
      %32 = vector.load %arg9[%c0_25, %c0_26] : memref<1x128xf32, #tpu.memory_space<vmem>>, vector<1x128xf32>
      %33 = vector.broadcast %32 : vector<1x128xf32> to vector<128x128xf32>
      %34 = arith.addf %31, %33 : vector<128x128xf32>
      %c0_27 = arith.constant 0 : index
      %c0_28 = arith.constant 0 : index
      %35 = vector.load %arg10[%c0_27, %c0_28] : memref<128x128xf32, #tpu.memory_space<vmem>>, vector<128x128xf32>
      tpu.vector_store %arg10[%c0_27, %c0_28], %34 {strides = array<i32>} : memref<128x128xf32, #tpu.memory_space<vmem>>, vector<128x128xf32>,
    } else {
    }
    return
  }
  func.func @transform_0(%arg0: i32, %arg1: i32) -> i32 {
    %c0_i32 = arith.constant 0 : i32
    %c0_i32_0 = arith.constant 0 : i32
    return %c0_i32 : i32
  }
  func.func @transform_1(%arg0: i32, %arg1: i32) -> (i32, i32) {
    %c0_i32 = arith.constant 0 : i32
    return %arg0, %arg1 : i32, i32
  }
  func.func @transform_2(%arg0: i32, %arg1: i32) -> (i32, i32) {
    %c0_i32 = arith.constant 0 : i32
    %c0_i32_0 = arith.constant 0 : i32
    return %arg1, %c0_i32 : i32, i32
  }
  func.func @transform_3(%arg0: i32, %arg1: i32) -> (i32, i32) {
    %c0_i32 = arith.constant 0 : i32
    %c0_i32_0 = arith.constant 0 : i32
    return %arg0, %c0_i32 : i32, i32
  }
  func.func @transform_4(%arg0: i32, %arg1: i32) -> (i32, i32) {
    %c0_i32 = arith.constant 0 : i32
    %c0_i32_0 = arith.constant 0 : i32
    %c0_i32_1 = arith.constant 0 : i32
    return %c0_i32, %c0_i32_0 : i32, i32
  }
  func.func @transform_5(%arg0: i32, %arg1: i32) -> (i32, i32) {
    %c0_i32 = arith.constant 0 : i32
    %c0_i32_0 = arith.constant 0 : i32
    %c0_i32_1 = arith.constant 0 : i32
    return %c0_i32, %c0_i32_0 : i32, i32
  }
  func.func @transform_6(%arg0: i32, %arg1: i32) -> (i32, i32) {
    %c0_i32 = arith.constant 0 : i32
    %c0_i32_0 = arith.constant 0 : i32
    %c0_i32_1 = arith.constant 0 : i32
    return %c0_i32, %c0_i32_0 : i32, i32
  }
  func.func @transform_7(%arg0: i32, %arg1: i32) -> (i32, i32) {
    %c0_i32 = arith.constant 0 : i32
    %c0_i32_0 = arith.constant 0 : i32
    %c0_i32_1 = arith.constant 0 : i32
    return %c0_i32, %c0_i32_0 : i32, i32
  }
  func.func @transform_8(%arg0: i32, %arg1: i32) -> (i32, i32) {
    %c0_i32 = arith.constant 0 : i32
    %c0_i32_0 = arith.constant 0 : i32
    return %arg0, %c0_i32 : i32, i32
  }
}

</mosaic_0001>

<bundles_post_ra>
// kernel: tpu_custom_call.1
= control target key start
LH: loop header
LB: loop body
LE: loop exit
PB: predicated region body
PF: predicated region fallthrough
CT: control target
= control target key end

     0   :  { %s2252_s0 = inlined_call_operand.<no memory space> [shape: f32[1], index: 0, kind: input, shape index: {}]   ;;  %s2253_s1 = inlined_call_operand.hbm [shape: s8[256,256], index: 1, kind: input, shape index: {}]   ;;  %s2254_s2 = inlined_call_operand.hbm [shape: bf16[256,128], index: 2, kind: input, shape index: {}]   ;;  %s2255_s3 = inlined_call_operand.hbm [shape: bf16[256,128], index: 3, kind: input, shape index: {}]   ;;  %s2256_s4 = inlined_call_operand.hbm [shape: bf16[128,128], index: 4, kind: input, shape index: {}]   ;;  %s2257_s5 = inlined_call_operand.vmem [shape: f32[1,128], index: 5, kind: input, shape index: {}]   ;;  %s2258_s6 = inlined_call_operand.hbm [shape: bf16[128,128], index: 6, kind: input, shape index: {}]   ;;  %s2259_s7 = inlined_call_operand.vmem [shape: f32[1,128], index: 7, kind: input, shape index: {}]   ;;  %s2260_s8 = inlined_call_operand.hbm [shape: f32[256,128], index: 8, kind: output, shape index: {}]  }
   0x1   :  { %2271 = sst [smem:[#allocation26_spill]] %s2253_s1 }
   0x2   :  { %2272 = sst [smem:[#allocation27_spill]] %s2254_s2 }
   0x3   :  { %2273 = sst [smem:[#allocation28_spill]] %s2255_s3 }
   0x4   :  { %2274 = sst [smem:[#allocation29_spill]] %s2260_s8 }
   0x5   :  { %13 = sst [smem:[#allocation3]] %s2252_s0 }
   0x6   :  { %14 = vsyncpa [#allocation5], 0 }
   0x7   :  { %16 = vsyncpa [#allocation5 + $0x1], 0 }
   0x8   :  { %17 = vsyncpa [#allocation8], 0 }
   0x9   :  { %18 = vsyncpa [#allocation12], 0 }
   0xa   :  { %19 = vsyncpa [#allocation6], 0 }
   0xb   :  { %21 = vsyncpa [#allocation6 + $0x1], 0  ;;  %s1989_s29 = smov 0   ;;  %s1991_s30 = smov 0  }
   0xc   :  { %s1993_s9 = smov 0   ;;  %s1995_s10 = smov 0  }
   0xd   :  { %s1997_s11 = smov 0   ;;  %s1999_s12 = smov 0  }
   0xe LB: > { %2275 = sst [smem:[#allocation20_spill]] %s1910_s29  ;;  %s2020_s0 = sadd.s32 4294967295, %s1930_s12   ;;  %s1930_s12 = sphi %s1999_s12, %s27_s12   ;;  %s1926_s11 = sphi %s1997_s11, %s2299_s11   ;;  %s1922_s10 = sphi %s1995_s10, %s2298_s10   ;;  %s1918_s9 = sphi %s1993_s9, %s2297_s9   ;;  %s1914_s30 = sphi %s1991_s30, %s2301_s30   ;;  %s1910_s29 = sphi %s1989_s29, %s2300_s29  }
   0xf   : > { %2276 = sst [smem:[#allocation21_spill]] %s1918_s9  ;;  %s1348_s13 = sadd.s32 4294967294, %s1930_s12  }
  0x10   : > { %2277 = sst [smem:[#allocation22_spill]] %s1926_s11  ;;  %p82_p0 = scmp.ne.s32.totalorder %s1914_s30, %s1910_s29 }
  0x11   : > { %p83_p1 = scmp.eq.s32.totalorder %s2020_s0, 0  ;;  %p242_p2 = scmp.eq.s32.totalorder %s2020_s0, 1 }
  0x12   : > { %p248_p3 = scmp.eq.s32.totalorder %s1348_s13, 1  ;;  %p1349_p5 = scmp.ge.s32.totalorder %s1930_s12, 1 }
  0x13   : > { %p2029_p4 = por %p83_p1, %p82_p0  ;;  %p255_p7 = scmp.lt.s32.totalorder %s1930_s12, 3 }
  0x14   : > { %p2034_p6 = por %p248_p3, %p82_p0  ;;  %s2281_s2 = sld [smem:[#allocation27_spill]] }
  0x15   : > { %p2042_p8 = pnand %p1349_p5, %p255_p7  ;;  %s1932_s20 = smov [#allocation7]  }
  0x16   : > { %s2279_s15 = scalar_select %p2034_p6, 1, 0 }
  0x17   : > { %p1594_p9 = pneg %p2042_p8  ;;  %s274_s21 = sshll.u32 %s1932_s20, 4  ;;  %s275_s21 = int_to_ptr.vmem [resolvable:$true] %s274_s21 }
  0x18   : > { %2280 = sst [smem:[#allocation23_spill]] %s2279_s15  ;;  %p1353_p11 = scmp.ge.s32.totalorder %s1930_s12, 2 }
  0x19   : > { %p2050_p10 = pnand %p1594_p9, %p83_p1  ;;  %s2261_s23 = smov 64  }
  0x1a   : > { %s272_s18 = sshll.u32 %s2281_s2, 4  ;;  %s2263_s24 = smov 4   ;;  %s273_s18 = int_to_ptr.hbm [resolvable:$true] %s272_s18 }
  0x1b   : > { %1597 = dma.hbm_to_vmem [thread:$0]  (!%p2050_p10), %s273_s18, 2048, %s275_s21, [#allocation8], %s2261_s23, %s2261_s23, %s2263_s24  }
  0x1c   : > { %s39_s25 = sadd.s32 1, %s1926_s11  ;;  %s69_s26 = sadd.s32 1, %s1918_s9 }
  0x1d   : > { %p41_p12 = scmp.ge.s32.totalorder %s39_s25, 2  ;;  %p76_p13 = scmp.ne.s32.totalorder %s1918_s9, %s1914_s30 }
  0x1e   : > { %p77_p0 = scmp.eq.s32.totalorder %s1930_s12, 0  ;;  %p1618_p7 = scmp.lt.s32.totalorder %s1930_s12, 2 }
  0x1f   : > { %s2303_s25 = smov (%p41_p12, %s39_s25), 0  ;;  %p2073_p5 = por %p242_p2, %p76_p13 }
  0x20   : > { %2284 = sst [smem:[#allocation24_spill]] %s2303_s25  ;;  %p2067_p3 = por %p77_p0, %p76_p13 }
  0x21   : > { %s64_s13 = ssub.s32 %s1926_s11, %s2303_s25  ;;  %s322_s16 = sand.u32 1, %s1930_s12  }
  0x22   : > { %p67_p9 = scmp.eq.s32.totalorder %s64_s13, 0  ;;  %s324_s17 = sand.u32 1, %s1918_s9  }
  0x23   : > { %s1354_s20 = sshll.u32 %s324_s17, 6  ;;  %s1502_s21 = sshll.u32 %s1926_s11, 6 }
  0x24   : > { %s2083_s18 = scalar_select %p67_p9, %s1918_s9, %s69_s26  }
  0x25   : > { %s2288_s1 = sld [smem:[#allocation26_spill]]  ;;  %s326_s29 = scalar_lea.vmem [#allocation4], %s1354_s20 }
  0x26   : > { %2287 = sst [smem:[#allocation25_spill]] %s2083_s18  ;;  %s337_s8 = sshll.u32 %s326_s29, 4  ;;  %s338_s8 = int_to_ptr.vmem [resolvable:$true] %s337_s8 }
  0x27   : > { %p2093_p2 = pnand %p1618_p7, %p2067_p3  ;;  %s2290_s3 = sld [smem:[#allocation28_spill]] }
  0x28   : > { %s323_s11 = scalar_lea.sflag [#allocation5], %s322_s16  ;;  %s1935_s23 = smov 256  }
  0x29   : > { %s1936_s24 = smov 16   ;;  %s351_s29 = scalar_lea.vmem [#allocation9], %s1354_s20 }
  0x2a   : > { %s359_s27 = sshll.u32 %s351_s29, 4  ;;  %s286_s9 = sshll.u32 %s2256_s4, 4  ;;  %s287_s9 = int_to_ptr.hbm [resolvable:$true] %s286_s9  ;;  %s360_s27 = int_to_ptr.vmem [resolvable:$true] %s359_s27 }
  0x2b   : > { %s334_s2 = scalar_lea.hbm %s2288_s1, %s1502_s21  ;;  %s1937_s13 = smov [#allocation10]  }
  0x2c   : > { %s335_s15 = sshll.u32 %s334_s2, 4  ;;  %s288_s26 = sshll.u32 %s1937_s13, 4  ;;  %s336_s15 = int_to_ptr.hbm [resolvable:$true] %s335_s15  ;;  %s289_s26 = int_to_ptr.vmem [resolvable:$true] %s288_s26 }
  0x2d   : > { %s356_s17 = scalar_lea.hbm %s2290_s3, %s1502_s21  ;;  %s303_s3 = sshll.u32 %s2258_s6, 4  ;;  %s304_s3 = int_to_ptr.hbm [resolvable:$true] %s303_s3 }
  0x2e   : > { %1607 = dma.hbm_to_vmem [thread:$0]  (!%p2093_p2), %s336_s15, 1024, %s338_s8, %s323_s11, %s1935_s23, %s1935_s23, %s1936_s24  }
  0x2f   : > { %s357_s2 = sshll.u32 %s356_s17, 4  ;;  %s2291_s8 = smov 4   ;;  %s358_s2 = int_to_ptr.hbm [resolvable:$true] %s357_s2 }
  0x30   : > { %s2292_s15 = smov 64   ;;  %s1938_s20 = smov [#allocation11]  }
  0x31   : > { %1600 = dma.hbm_to_vmem [thread:$0]  (!%p2050_p10), %s287_s9, 1024, %s289_s26, [#allocation8], %s2292_s15, %s2292_s15, %s2291_s8  }
  0x32   : > { %s305_s17 = sshll.u32 %s1938_s20, 4  ;;  %371 = sbr.rel (%p2042_p8) target bundleno = 642 (0x282), region = 52  ;;  %s306_s17 = int_to_ptr.vmem [resolvable:$true] %s305_s17 }
  0x33   : > { %1603 = dma.hbm_to_vmem [thread:$0]  (!%p2050_p10), %s304_s3, 1024, %s306_s17, [#allocation12], %s2292_s15, %s2292_s15, %s2291_s8  }
  0x34   : > { %1610 = dma.hbm_to_vmem [thread:$0]  (!%p2093_p2), %s358_s2, 1024, %s360_s27, %s323_s11, %s2292_s15, %s2292_s15, %s2291_s8  }
  0x35   : > { %s373_s1 = sand.u32 (!%p2042_p8), 1, %s2020_s0   ;;  %s2127_s9 = sand.u32 (!%p2042_p8), 1, %s1914_s30  }
  0x36   : > { %s1362_s22 = sshll.u32 (!%p2042_p8), %s2127_s9, 6  ;;  %s374_s18 = scalar_lea.sflag (!%p2042_p8), [#allocation5], %s373_s1 }
  0x37   : > { %s2130_s23 = scalar_lea.vmem [#allocation4], %s1362_s22 }
  0x38   : > { %1885 = dma.done.wait (%p2029_p4), %s374_s18, 1024  }
  0x39   : > { %1887 = vsyncadd (%p2029_p4), %s374_s18, 4294966272 }
  0x3a   : > { %1889 = dma.done.wait (%p83_p1), [#allocation8], 2048  }
  0x3b   : > { %1891 = vsyncadd (%p83_p1), [#allocation8], 4294965248  ;;  %s2140_s3 = scalar_lea.vmem [#allocation9], %s1362_s22 }
  0x3c   : > { %1893 = dma.done.wait (%p2029_p4), %s374_s18, 1024  }
  0x3d   : > { %1895 = vsyncadd (%p2029_p4), %s374_s18, 4294966272 }
  0x3e   : > { %1897 = dma.done.wait (%p83_p1), [#allocation8], 1024  }
  0x3f   : > { %1899 = vsyncadd (%p83_p1), [#allocation8], 4294966272 }
  0x40   : > { %1901 = dma.done.wait (%p83_p1), [#allocation12], 1024  }
  0x41   : > { %1903 = vsyncadd (%p83_p1), [#allocation12], 4294966272  ;;  %v1511_v0 = vld [vmem:[#allocation7 + $0x38] sm:$0xff]  ;;  %v1510_v2 = vld [vmem:[#allocation7 + $0x30] sm:$0xff]  ;;  %s831_s11 = sld [smem:[#allocation3]]  ;;  %s1367_s25 = sshll.u32 %s2127_s9, 7 }
  0x42   : > { %v1519_v1 = vld [vmem:[#allocation7 + $0x78] sm:$0xff]  ;;  %698 = vmatpush.bf16.msra.mxu0 %v1511_v0  ;;  %v1518_v3 = vld [vmem:[#allocation7 + $0x70] sm:$0xff]  ;;  %v1509_v4 = vld [vmem:[#allocation7 + $0x28] sm:$0xff]  ;;  %s2195_s29 = scalar_lea.vmem [#allocation13], %s1367_s25  ;;  %s1536_s27 = sshll.u32 %s1922_s10, 7 }
  0x43   : > { %747 = vmatpush.bf16.msra.mxu1 %v1519_v1  ;;  %v1517_v5 = vld [vmem:[#allocation7 + $0x68] sm:$0xff]  ;;  %v1508_v6 = vld [vmem:[#allocation7 + $0x20] sm:$0xff]  ;;  %v1507_v8 = vld [vmem:[#allocation7 + $0x18] sm:$0xff]  ;;  %s2293_s21 = sld [smem:[#allocation29_spill]]  ;;  %s1209_s8 = sshll.u32 %s2195_s29, 4  ;;  %s1210_s8 = int_to_ptr.vmem [resolvable:$true] %s1209_s8 }
  0x44   : > { %v1516_v7 = vld [vmem:[#allocation7 + $0x60] sm:$0xff]  ;;  %v1515_v9 = vld [vmem:[#allocation7 + $0x58] sm:$0xff]  ;;  %v1506_v10 = vld [vmem:[#allocation7 + $0x10] sm:$0xff]  ;;  %s1197_s20 = scalar_lea.sflag [#allocation6], %s2127_s9 }
  0x45   : > { %v1514_v11 = vld [vmem:[#allocation7 + $0x50] sm:$0xff]  ;;  %v466_v12 = vld [vmem:[%s2130_s23] sm:$0xff]  ;;  %v467_v13 = vld [vmem:[%s2130_s23 + $0x8] sm:$0xff] }
  0x46   : > { %699 = vmatpush.bf16.msra.mxu0 %v1510_v2  ;;  %v474_v14 = vunpack.c.0.s8 %v466_v12  ;;  %v476_v15 = vunpack.c.1.s8 %v466_v12  ;;  %v475_v16 = vunpack.c.0.s8 %v467_v13  ;;  %v477_v17 = vunpack.c.1.s8 %v467_v13  ;;  %v1505_v18 = vld [vmem:[#allocation7 + $0x8] sm:$0xff]  ;;  %v1504_v24 = vld [vmem:[#allocation7] sm:$0xff]  ;;  %v468_v38 = vld [vmem:[%s2130_s23 + $0x10] sm:$0xff] }
  0x47   : > { %748 = vmatpush.bf16.msra.mxu1 %v1518_v3  ;;  %v1513_v19 = vld [vmem:[#allocation7 + $0x48] sm:$0xff]  ;;  %v1512_v25 = vld [vmem:[#allocation7 + $0x40] sm:$0xff]  ;;  %v478_v28 = vunpack.c.2.s8 %v466_v12  ;;  %v480_v29 = vunpack.c.3.s8 %v466_v12  ;;  %v479_v30 = vunpack.c.2.s8 %v467_v13  ;;  %v481_v31 = vunpack.c.3.s8 %v467_v13  ;;  %v469_v39 = vld [vmem:[%s2130_s23 + $0x18] sm:$0xff]  ;;  %s832_s0 = sadd.f32 1.0, %s831_s11 }
  0x48   : > { %v506_v20 = vcvt.s32.f32 %v474_v14  ;;  %v508_v21 = vcvt.s32.f32 %v476_v15  ;;  %v507_v22 = vcvt.s32.f32 %v475_v16  ;;  %v509_v23 = vcvt.s32.f32 %v477_v17  ;;  %v470_v60 = vld [vmem:[%s2130_s23 + $0x20] sm:$0xff]  ;;  %v471_v61 = vld [vmem:[%s2130_s23 + $0x28] sm:$0xff] }
  0x49   : > { %v510_v32 = vcvt.s32.f32 %v478_v28  ;;  %v512_v33 = vcvt.s32.f32 %v480_v29  ;;  %v511_v34 = vcvt.s32.f32 %v479_v30  ;;  %v513_v35 = vcvt.s32.f32 %v481_v31  ;;  %s1208_s16 = scalar_lea.hbm %s2293_s21, %s1536_s27  ;;  %s1852_s18 = scalar_lea.hbm %s2293_s21, 256 }
  0x4a   : > { %700 = vmatpush.bf16.msra.mxu0 %v1509_v4  ;;  %v538_v26 = vpack.c.bf16 %v508_v21, %v506_v20  ;;  %v539_v27 = vpack.c.bf16 %v509_v23, %v507_v22  ;;  %v482_v40 = vunpack.c.0.s8 %v468_v38  ;;  %v484_v41 = vunpack.c.1.s8 %v468_v38  ;;  %v472_v20 = vld [vmem:[%s2130_s23 + $0x30] sm:$0xff]  ;;  %v473_v21 = vld [vmem:[%s2130_s23 + $0x38] sm:$0xff]  ;;  %v1525_v22 = vld [vmem:[#allocation10 + $0x28] sm:$0xff]  ;;  %s1211_s15 = sshll.u32 %s1208_s16, 4  ;;  %s1212_s15 = int_to_ptr.hbm [resolvable:$true] %s1211_s15 }
  0x4b   : > { %749 = vmatpush.bf16.msra.mxu1 %v1517_v5  ;;  %v540_v36 = vpack.c.bf16 %v512_v33, %v510_v32  ;;  %v541_v37 = vpack.c.bf16 %v513_v35, %v511_v34  ;;  %v483_v42 = vunpack.c.0.s8 %v469_v39  ;;  %v485_v43 = vunpack.c.1.s8 %v469_v39  ;;  %v1523_v32 = vld [vmem:[#allocation10 + $0x18] sm:$0xff]  ;;  %v1522_v35 = vld [vmem:[#allocation10 + $0x10] sm:$0xff]  ;;  %s1846_s17 = sshra.s32 %s1212_s15, 4  ;;  %s1847_s17 = int_to_ptr.hbm [resolvable:$true] %s1846_s17 }
  0x4c   : > { %v514_v44 = vcvt.s32.f32 %v482_v40  ;;  %v516_v45 = vcvt.s32.f32 %v484_v41  ;;  %v486_v50 = vunpack.c.2.s8 %v468_v38  ;;  %v488_v51 = vunpack.c.3.s8 %v468_v38  ;;  %v1520_v41 = vld [vmem:[#allocation10] sm:$0xff]  ;;  %s1848_s1 = scalar_lea.hbm %s1847_s17, 128  ;;  %p1853_p10 = scmp.lt.s32.totalorder %s1847_s17, %s2293_s21 }
  0x4d   : > { %v515_v46 = vcvt.s32.f32 %v483_v42  ;;  %v517_v47 = vcvt.s32.f32 %v485_v43  ;;  %v487_v52 = vunpack.c.2.s8 %v469_v39  ;;  %v489_v53 = vunpack.c.3.s8 %v469_v39  ;;  %p1849_p1 = scmp.ne.s32.totalorder %s1847_s17, %s1848_s1  ;;  %p1854_p12 = scmp.lt.s32.totalorder %s1852_s18, %s1848_s1 }
  0x4e   : > { %701 = vmatpush.bf16.msra.mxu0 %v1508_v6  ;;  %v542_v48 = vpack.c.bf16 %v516_v45, %v514_v44  ;;  %v518_v54 = vcvt.s32.f32 %v486_v50  ;;  %v520_v55 = vcvt.s32.f32 %v488_v51  ;;  %v490_v62 = vunpack.c.0.s8 %v470_v60  ;;  %v1538_v50 = vld [vmem:[%s2140_s3] sm:$0xff]  }
  0x4f   : > { %750 = vmatpush.bf16.msra.mxu1 %v1516_v7  ;;  %v543_v49 = vpack.c.bf16 %v517_v47, %v515_v46  ;;  %v519_v56 = vcvt.s32.f32 %v487_v52  ;;  %v521_v57 = vcvt.s32.f32 %v489_v53  ;;  %v492_v63 = vunpack.c.1.s8 %v470_v60  ;;  %p1850_p4 = pnand %p1849_p1, %p2073_p5  ;;  %p1855_p13 = por %p1854_p12, %p1853_p10 }
  0x50   : > { %v544_v58 = vpack.c.bf16 %v520_v55, %v518_v54  ;;  %v491_v0 = vunpack.c.0.s8 %v471_v61  ;;  %v493_v1 = vunpack.c.1.s8 %v471_v61  ;;  %v522_v2 = vcvt.s32.f32 %v490_v62 }
  0x51   : > { %v545_v59 = vpack.c.bf16 %v521_v57, %v519_v56  ;;  %v524_v3 = vcvt.s32.f32 %v492_v63  ;;  %v497_v12 = vunpack.c.3.s8 %v471_v61  ;;  %v498_v23 = vunpack.c.0.s8 %v472_v20  ;;  %p1851_p8 = pneg %p1850_p4 }
  0x52   : > { %702 = vmatpush.bf16.msra.mxu0 %v1507_v8  ;;  %v523_v4 = vcvt.s32.f32 %v491_v0  ;;  %v525_v5 = vcvt.s32.f32 %v493_v1  ;;  %v1527_v8 = vld [vmem:[#allocation10 + $0x38] sm:$0xff]  ;;  %v504_v38 = vunpack.c.3.s8 %v472_v20  ;;  %v503_v39 = vunpack.c.2.s8 %v473_v21  ;;  %v1569_v1 = vld [vmem:[%s2140_s3 + $0x8] sm:$0xff]  }
  0x53   : > { %751 = vmatpush.bf16.msra.mxu1 %v1515_v9  ;;  %v546_v6 = vpack.c.bf16 %v524_v3, %v522_v2  ;;  %990 = vmatpush.bf16.msra.mxu2 %v1527_v8  ;;  %v494_v9 = vunpack.c.2.s8 %v470_v60  ;;  %v529_v16 = vcvt.s32.f32 %v497_v12  ;;  %v530_v28 = vcvt.s32.f32 %v498_v23  ;;  %p1856_p0 = pnand %p1855_p13, %p1851_p8 }
  0x54   : > { %v547_v7 = vpack.c.bf16 %v525_v5, %v523_v4  ;;  %v505_v40 = vunpack.c.3.s8 %v473_v21  ;;  %v536_v43 = vcvt.s32.f32 %v504_v38  ;;  %v535_v44 = vcvt.s32.f32 %v503_v39 }
  0x55   : > { %v526_v13 = vcvt.s32.f32 %v494_v9  ;;  %v1539_v51 = vunpack.c.l.bf16 %v1538_v50  ;;  %v1540_v52 = vunpack.c.h.bf16 %v1538_v50  ;;  %v2163_v53 = vstv %s832_s0 }
  0x56   : > { %703 = vmatpush.bf16.msra.mxu0 %v1506_v10  ;;  %v496_v10 = vunpack.c.3.s8 %v470_v60  ;;  %v537_v45 = vcvt.s32.f32 %v505_v40  ;;  %v1543_v2 = vunpack.c.l.bf16 %v1569_v1  ;;  %v1544_v3 = vunpack.c.h.bf16 %v1569_v1 }
  0x57   : > { %752 = vmatpush.bf16.msra.mxu1 %v1514_v11  ;;  %v495_v11 = vunpack.c.2.s8 %v471_v61  ;;  %v866_v55 = vmul.f32 %v1539_v51, %v2163_v53  ;;  %v867_v56 = vmul.f32 %v1540_v52, %v2163_v53 }
  0x58   : > { %v528_v14 = vcvt.s32.f32 %v496_v10  ;;  %v553_v47 = vpack.c.bf16 %v537_v45, %v535_v44  ;;  %v868_v5 = vmul.f32 %v1543_v2, %v2163_v53 }
  0x59   : > { %v527_v15 = vcvt.s32.f32 %v495_v11 }
  0x5a   : > { %704 = vmatpush.bf16.msra.mxu0 %v1505_v18  ;;  %v548_v17 = vpack.c.bf16 %v528_v14, %v526_v13 }
  0x5b   : > { %753 = vmatpush.bf16.msra.mxu1 %v1513_v19  ;;  %v549_v18 = vpack.c.bf16 %v529_v16, %v527_v15  ;;  %v1526_v19 = vld [vmem:[#allocation10 + $0x30] sm:$0xff] }
  0x5c   : > { %991 = vmatpush.bf16.msra.mxu2 %v1526_v19  ;;  %v1570_v15 = vld [vmem:[%s2140_s3 + $0x10] sm:$0xff]  }
  0x5d   : > { %v1547_v16 = vunpack.c.l.bf16 %v1570_v15 }
  0x5e   : > { %705 = vmatpush.bf16.msra.mxu0 %v1504_v24  ;;  %v500_v24 = vunpack.c.1.s8 %v472_v20 }
  0x5f   : > { %754 = vmatpush.bf16.msra.mxu1 %v1512_v25  ;;  %v499_v25 = vunpack.c.0.s8 %v473_v21  ;;  %v870_v19 = vmul.f32 %v1547_v16, %v2163_v53 }
  0x60   : > { %992 = vmatpush.bf16.msra.mxu2 %v1525_v22  ;;  %v532_v29 = vcvt.s32.f32 %v500_v24 }
  0x61   : > { %706 = vmatmul.bf16.vlgmr.msra.gmra.mxu0 %v538_v26  ;;  %v501_v26 = vunpack.c.1.s8 %v473_v21  ;;  %v531_v30 = vcvt.s32.f32 %v499_v25 }
  0x62   : > { %755 = vmatmul.bf16.vlgmr.msra.gmra.mxu1 %v539_v27  ;;  %v1524_v27 = vld [vmem:[#allocation10 + $0x20] sm:$0xff]  ;;  %v550_v33 = vpack.c.bf16 %v532_v29, %v530_v28  ;;  %v1571_v29 = vld [vmem:[%s2140_s3 + $0x18] sm:$0xff]  }
  0x63   : > { %v533_v31 = vcvt.s32.f32 %v501_v26 }
  0x64   : > { %993 = vmatpush.bf16.msra.mxu2 %v1524_v27 }
  0x65   : > { %v551_v34 = vpack.c.bf16 %v533_v31, %v531_v30  ;;  %v1551_v30 = vunpack.c.l.bf16 %v1571_v29  ;;  %v1552_v31 = vunpack.c.h.bf16 %v1571_v29 }
  0x68   : > { %994 = vmatpush.bf16.msra.mxu2 %v1523_v32 }
  0x6c   : > { %995 = vmatpush.bf16.msra.mxu2 %v1522_v35 }
  0x71   : > { %711 = vmatmul.bf16.gmra.mxu0 %v540_v36  ;;  %v1521_v36 = vld [vmem:[#allocation10 + $0x8] sm:$0xff] }
  0x72   : > { %760 = vmatmul.bf16.gmra.mxu1 %v541_v37  ;;  %v502_v37 = vunpack.c.2.s8 %v472_v20  ;;  %996 = vmatpush.bf16.msra.mxu2 %v1521_v36 }
  0x74   : > { %v534_v42 = vcvt.s32.f32 %v502_v37 }
  0x76   : > { %997 = vmatpush.bf16.msra.mxu2 %v1520_v41  ;;  %v552_v46 = vpack.c.bf16 %v536_v43, %v534_v42  ;;  %v1572_v43 = vld [vmem:[%s2140_s3 + $0x20] sm:$0xff]  }
  0x77   : > { %v1555_v44 = vunpack.c.l.bf16 %v1572_v43  ;;  %v1556_v45 = vunpack.c.h.bf16 %v1572_v43  ;;  %v1680_v43 = vld [vmem:[%s2257_s5] ss:$0 sm:$0xff] }
  0x81   : > { %716 = vmatmul.bf16.gmra.mxu0 %v542_v48 }
  0x82   : > { %765 = vmatmul.bf16.gmra.mxu1 %v543_v49 }
  0x91   : > { %721 = vmatmul.bf16.gmra.mxu0 %v544_v58 }
  0x92   : > { %770 = vmatmul.bf16.gmra.mxu1 %v545_v59 }
  0xa1   : > { %726 = vmatmul.bf16.gmra.mxu0 %v546_v6  ;;  %v869_v6 = vmul.f32 %v1544_v3, %v2163_v53 }
  0xa2   : > { %775 = vmatmul.bf16.gmra.mxu1 %v547_v7 }
  0xb1   : > { %731 = vmatmul.bf16.gmra.mxu0 %v548_v17  ;;  %v1548_v17 = vunpack.c.h.bf16 %v1570_v15 }
  0xb2   : > { %780 = vmatmul.bf16.gmra.mxu1 %v549_v18 }
  0xb3   : > { %v871_v20 = vmul.f32 %v1548_v17, %v2163_v53 }
  0xc1   : > { %736 = vmatmul.bf16.gmra.mxu0 %v550_v33  ;;  %v872_v33 = vmul.f32 %v1551_v30, %v2163_v53  ;;  %v1530_v30 = vld [vmem:[#allocation11 + $0x10] sm:$0xff] }
  0xc2   : > { %785 = vmatmul.bf16.gmra.mxu1 %v551_v34  ;;  %v873_v34 = vmul.f32 %v1552_v31, %v2163_v53 }
  0xd1   : > { %741 = vmatmul.bf16.gmra.mxu0 %v552_v46 }
  0xd2   : > { %790 = vmatmul.bf16.gmra.mxu1 %v553_v47  ;;  %v874_v47 = vmul.f32 %v1555_v44, %v2163_v53 }
  0xde   : > { %v707_v48 = vpop.f32.mrf.mxu0 }
  0xdf   : > { %v756_v49 = vpop.f32.mrf.mxu1 }
  0xe0   : > { %v757_v54 = vadd.f32 %v756_v49, %v707_v48  ;;  %v875_v48 = vmul.f32 %v1556_v45, %v2163_v53 }
  0xe2   : > { %v898_v60 = vadd.f32 %v866_v55, %v757_v54 }
  0xe6   : > { %v709_v57 = vpop.f32.mrf.mxu0 }
  0xe7   : > { %v758_v58 = vpop.f32.mrf.mxu1 }
  0xe8   : > { %v759_v59 = vadd.f32 %v758_v58, %v709_v57  ;;  %v1573_v58 = vld [vmem:[%s2140_s3 + $0x28] sm:$0xff]  }
  0xea   : > { %v899_v61 = vadd.f32 %v867_v56, %v759_v59  ;;  %v1559_v59 = vunpack.c.l.bf16 %v1573_v58 }
  0xec   : > { %v914_v62 = vpack.c.bf16 %v899_v61, %v898_v60  ;;  %v1560_v60 = vunpack.c.h.bf16 %v1573_v58 }
  0xee   : > { %998 = vmatmul.bf16.vlgmr.msra.gmra.mxu2 %v914_v62  ;;  %v712_v63 = vpop.f32.mrf.mxu0  ;;  %v876_v62 = vmul.f32 %v1559_v59, %v2163_v53 }
  0xef   : > { %v761_v0 = vpop.f32.mrf.mxu1 }
  0xf0   : > { %v762_v4 = vadd.f32 %v761_v0, %v712_v63  ;;  %v877_v63 = vmul.f32 %v1560_v60, %v2163_v53 }
  0xf2   : > { %v900_v10 = vadd.f32 %v868_v5, %v762_v4 }
  0xf6   : > { %v714_v7 = vpop.f32.mrf.mxu0 }
  0xf7   : > { %v763_v8 = vpop.f32.mrf.mxu1 }
  0xf8   : > { %v764_v9 = vadd.f32 %v763_v8, %v714_v7 }
  0xfa   : > { %v901_v11 = vadd.f32 %v869_v6, %v764_v9  ;;  %v1535_v6 = vld [vmem:[#allocation11 + $0x38] sm:$0xff]  ;;  %v1574_v9 = vld [vmem:[%s2140_s3 + $0x30] sm:$0xff]  }
  0xfb   : > { %1131 = vmatpush.bf16.msra.mxu3 %v1535_v6 }
  0xfc   : > { %v915_v12 = vpack.c.bf16 %v901_v11, %v900_v10  ;;  %v1534_v10 = vld [vmem:[#allocation11 + $0x30] sm:$0xff]  ;;  %v1563_v11 = vunpack.c.l.bf16 %v1574_v9 }
  0xfe   : > { %1003 = vmatmul.bf16.gmra.mxu2 %v915_v12  ;;  %v717_v13 = vpop.f32.mrf.mxu0  ;;  %v1564_v12 = vunpack.c.h.bf16 %v1574_v9  ;;  %v878_v15 = vmul.f32 %v1563_v11, %v2163_v53 }
  0xff   : > { %v766_v14 = vpop.f32.mrf.mxu1  ;;  %1132 = vmatpush.bf16.msra.mxu3 %v1534_v10 }
 0x100   : > { %v767_v18 = vadd.f32 %v766_v14, %v717_v13  ;;  %v1533_v13 = vld [vmem:[#allocation11 + $0x28] sm:$0xff]  ;;  %v879_v16 = vmul.f32 %v1564_v12, %v2163_v53 }
 0x102   : > { %v902_v24 = vadd.f32 %v870_v19, %v767_v18 }
 0x103   : > { %1133 = vmatpush.bf16.msra.mxu3 %v1533_v13 }
 0x106   : > { %v719_v21 = vpop.f32.mrf.mxu0 }
 0x107   : > { %v768_v22 = vpop.f32.mrf.mxu1 }
 0x108   : > { %v769_v23 = vadd.f32 %v768_v22, %v719_v21 }
 0x10a   : > { %v903_v25 = vadd.f32 %v871_v20, %v769_v23  ;;  %v1532_v20 = vld [vmem:[#allocation11 + $0x20] sm:$0xff] }
 0x10b   : > { %1134 = vmatpush.bf16.msra.mxu3 %v1532_v20 }
 0x10c   : > { %v916_v26 = vpack.c.bf16 %v903_v25, %v902_v24 }
 0x10e   : > { %1008 = vmatmul.bf16.gmra.mxu2 %v916_v26  ;;  %v722_v27 = vpop.f32.mrf.mxu0  ;;  %v1575_v26 = vld [vmem:[%s2140_s3 + $0x38] sm:$0xff]  }
 0x10f   : > { %v771_v28 = vpop.f32.mrf.mxu1  ;;  %v1568_v29 = vunpack.c.h.bf16 %v1575_v26 }
 0x110   : > { %v772_v32 = vadd.f32 %v771_v28, %v722_v27  ;;  %v1531_v27 = vld [vmem:[#allocation11 + $0x18] sm:$0xff]  ;;  %v1567_v28 = vunpack.c.l.bf16 %v1575_v26 }
 0x111   : > { %1135 = vmatpush.bf16.msra.mxu3 %v1531_v27 }
 0x112   : > { %v904_v38 = vadd.f32 %v872_v33, %v772_v32  ;;  %v880_v32 = vmul.f32 %v1567_v28, %v2163_v53  ;;  %v881_v33 = vmul.f32 %v1568_v29, %v2163_v53 }
 0x115   : > { %1136 = vmatpush.bf16.msra.mxu3 %v1530_v30 }
 0x116   : > { %v724_v35 = vpop.f32.mrf.mxu0 }
 0x117   : > { %v773_v36 = vpop.f32.mrf.mxu1 }
 0x118   : > { %v774_v37 = vadd.f32 %v773_v36, %v724_v35  ;;  %v1529_v36 = vld [vmem:[#allocation11 + $0x8] sm:$0xff] }
 0x119   : > { %1137 = vmatpush.bf16.msra.mxu3 %v1529_v36 }
 0x11a   : > { %v905_v39 = vadd.f32 %v873_v34, %v774_v37 }
 0x11c   : > { %v917_v40 = vpack.c.bf16 %v905_v39, %v904_v38 }
 0x11e   : > { %1013 = vmatmul.bf16.gmra.mxu2 %v917_v40  ;;  %v727_v41 = vpop.f32.mrf.mxu0  ;;  %v1528_v40 = vld [vmem:[#allocation11] sm:$0xff] }
 0x11f   : > { %v776_v42 = vpop.f32.mrf.mxu1  ;;  %1138 = vmatpush.bf16.msra.mxu3 %v1528_v40 }
 0x120   : > { %v777_v46 = vadd.f32 %v776_v42, %v727_v41 }
 0x122   : > { %v906_v52 = vadd.f32 %v874_v47, %v777_v46 }
 0x126   : > { %v729_v49 = vpop.f32.mrf.mxu0 }
 0x127   : > { %v778_v50 = vpop.f32.mrf.mxu1 }
 0x128   : > { %v779_v51 = vadd.f32 %v778_v50, %v729_v49 }
 0x12a   : > { %v907_v54 = vadd.f32 %v875_v48, %v779_v51 }
 0x12c   : > { %v918_v55 = vpack.c.bf16 %v907_v54, %v906_v52 }
 0x12e   : > { %1018 = vmatmul.bf16.gmra.mxu2 %v918_v55  ;;  %v732_v56 = vpop.f32.mrf.mxu0 }
 0x12f   : > { %v781_v57 = vpop.f32.mrf.mxu1 }
 0x130   : > { %v782_v61 = vadd.f32 %v781_v57, %v732_v56 }
 0x132   : > { %v908_v3 = vadd.f32 %v876_v62, %v782_v61 }
 0x136   : > { %v734_v0 = vpop.f32.mrf.mxu0 }
 0x137   : > { %v783_v1 = vpop.f32.mrf.mxu1 }
 0x138   : > { %v784_v2 = vadd.f32 %v783_v1, %v734_v0 }
 0x13a   : > { %v909_v4 = vadd.f32 %v877_v63, %v784_v2 }
 0x13c   : > { %v919_v5 = vpack.c.bf16 %v909_v4, %v908_v3 }
 0x13e   : > { %1023 = vmatmul.bf16.gmra.mxu2 %v919_v5  ;;  %v737_v7 = vpop.f32.mrf.mxu0 }
 0x13f   : > { %v786_v8 = vpop.f32.mrf.mxu1 }
 0x140   : > { %v787_v14 = vadd.f32 %v786_v8, %v737_v7 }
 0x142   : > { %v910_v21 = vadd.f32 %v878_v15, %v787_v14 }
 0x146   : > { %v739_v17 = vpop.f32.mrf.mxu0 }
 0x147   : > { %v788_v18 = vpop.f32.mrf.mxu1 }
 0x148   : > { %v789_v19 = vadd.f32 %v788_v18, %v739_v17 }
 0x14a   : > { %v911_v22 = vadd.f32 %v879_v16, %v789_v19 }
 0x14c   : > { %v920_v23 = vpack.c.bf16 %v911_v22, %v910_v21 }
 0x14e   : > { %1028 = vmatmul.bf16.gmra.mxu2 %v920_v23  ;;  %v742_v24 = vpop.f32.mrf.mxu0 }
 0x14f   : > { %v791_v25 = vpop.f32.mrf.mxu1 }
 0x150   : > { %v792_v31 = vadd.f32 %v791_v25, %v742_v24 }
 0x152   : > { %v912_v38 = vadd.f32 %v880_v32, %v792_v31 }
 0x156   : > { %v744_v34 = vpop.f32.mrf.mxu0 }
 0x157   : > { %v793_v35 = vpop.f32.mrf.mxu1 }
 0x158   : > { %v794_v37 = vadd.f32 %v793_v35, %v744_v34  ;;  %v1681_v35 = vld [vmem:[%s2259_s7] ss:$0 sm:$0xff] }
 0x15a   : > { %v913_v39 = vadd.f32 %v881_v33, %v794_v37 }
 0x15c   : > { %v921_v41 = vpack.c.bf16 %v913_v39, %v912_v38 }
 0x15e   : > { %1033 = vmatmul.bf16.gmra.mxu2 %v921_v41 }
 0x171   : > { %v999_v42 = vpop.f32.mrf.mxu2 }
 0x172   : > { %v1000_v44 = vadd.f32 %v1680_v43, %v999_v42 }
 0x174   : > { %v1039_v53 = vmax.f32 %v1000_v44, 0.0 }
 0x179   : > { %v1001_v45 = vpop.f32.mrf.mxu2 }
 0x17a   : > { %v1002_v46 = vadd.f32 %v1680_v43, %v1001_v45 }
 0x17c   : > { %v1040_v47 = vmax.f32 %v1002_v46, 0.0 }
 0x17e   : > { %v1055_v48 = vpack.c.bf16 %v1040_v47, %v1039_v53 }
 0x180   : > { %1139 = vmatmul.bf16.vlgmr.msra.gmra.mxu3 %v1055_v48 }
 0x181   : > { %v1004_v49 = vpop.f32.mrf.mxu2 }
 0x182   : > { %v1005_v50 = vadd.f32 %v1680_v43, %v1004_v49 }
 0x184   : > { %v1041_v54 = vmax.f32 %v1005_v50, 0.0 }
 0x189   : > { %v1006_v51 = vpop.f32.mrf.mxu2 }
 0x18a   : > { %v1007_v52 = vadd.f32 %v1680_v43, %v1006_v51 }
 0x18c   : > { %v1042_v55 = vmax.f32 %v1007_v52, 0.0 }
 0x18e   : > { %v1056_v56 = vpack.c.bf16 %v1042_v55, %v1041_v54 }
 0x190   : > { %1144 = vmatmul.bf16.gmra.mxu3 %v1056_v56 }
 0x191   : > { %v1009_v57 = vpop.f32.mrf.mxu2 }
 0x192   : > { %v1010_v58 = vadd.f32 %v1680_v43, %v1009_v57 }
 0x194   : > { %v1043_v61 = vmax.f32 %v1010_v58, 0.0 }
 0x199   : > { %v1011_v59 = vpop.f32.mrf.mxu2 }
 0x19a   : > { %v1012_v60 = vadd.f32 %v1680_v43, %v1011_v59 }
 0x19c   : > { %v1044_v62 = vmax.f32 %v1012_v60, 0.0 }
 0x19e   : > { %v1057_v63 = vpack.c.bf16 %v1044_v62, %v1043_v61 }
 0x1a0   : > { %1149 = vmatmul.bf16.gmra.mxu3 %v1057_v63 }
 0x1a1   : > { %v1014_v0 = vpop.f32.mrf.mxu2 }
 0x1a2   : > { %v1015_v1 = vadd.f32 %v1680_v43, %v1014_v0 }
 0x1a4   : > { %v1045_v4 = vmax.f32 %v1015_v1, 0.0 }
 0x1a9   : > { %v1016_v2 = vpop.f32.mrf.mxu2 }
 0x1aa   : > { %v1017_v3 = vadd.f32 %v1680_v43, %v1016_v2 }
 0x1ac   : > { %v1046_v5 = vmax.f32 %v1017_v3, 0.0 }
 0x1ae   : > { %v1058_v6 = vpack.c.bf16 %v1046_v5, %v1045_v4 }
 0x1b0   : > { %1154 = vmatmul.bf16.gmra.mxu3 %v1058_v6 }
 0x1b1   : > { %v1019_v7 = vpop.f32.mrf.mxu2 }
 0x1b2   : > { %v1020_v8 = vadd.f32 %v1680_v43, %v1019_v7 }
 0x1b4   : > { %v1047_v11 = vmax.f32 %v1020_v8, 0.0 }
 0x1b9   : > { %v1021_v9 = vpop.f32.mrf.mxu2 }
 0x1ba   : > { %v1022_v10 = vadd.f32 %v1680_v43, %v1021_v9 }
 0x1bc   : > { %v1048_v12 = vmax.f32 %v1022_v10, 0.0 }
 0x1be   : > { %v1059_v13 = vpack.c.bf16 %v1048_v12, %v1047_v11 }
 0x1c0   : > { %1159 = vmatmul.bf16.gmra.mxu3 %v1059_v13 }
 0x1c1   : > { %v1024_v14 = vpop.f32.mrf.mxu2 }
 0x1c2   : > { %v1025_v15 = vadd.f32 %v1680_v43, %v1024_v14 }
 0x1c4   : > { %v1049_v18 = vmax.f32 %v1025_v15, 0.0 }
 0x1c9   : > { %v1026_v16 = vpop.f32.mrf.mxu2 }
 0x1ca   : > { %v1027_v17 = vadd.f32 %v1680_v43, %v1026_v16 }
 0x1cc   : > { %v1050_v19 = vmax.f32 %v1027_v17, 0.0 }
 0x1ce   : > { %v1060_v20 = vpack.c.bf16 %v1050_v19, %v1049_v18 }
 0x1d0   : > { %1164 = vmatmul.bf16.gmra.mxu3 %v1060_v20 }
 0x1d1   : > { %v1029_v21 = vpop.f32.mrf.mxu2 }
 0x1d2   : > { %v1030_v22 = vadd.f32 %v1680_v43, %v1029_v21 }
 0x1d4   : > { %v1051_v25 = vmax.f32 %v1030_v22, 0.0 }
 0x1d9   : > { %v1031_v23 = vpop.f32.mrf.mxu2 }
 0x1da   : > { %v1032_v24 = vadd.f32 %v1680_v43, %v1031_v23 }
 0x1dc   : > { %v1052_v26 = vmax.f32 %v1032_v24, 0.0 }
 0x1de   : > { %v1061_v27 = vpack.c.bf16 %v1052_v26, %v1051_v25 }
 0x1e0   : > { %1169 = vmatmul.bf16.gmra.mxu3 %v1061_v27 }
 0x1e1   : > { %v1034_v28 = vpop.f32.mrf.mxu2 }
 0x1e2   : > { %v1035_v29 = vadd.f32 %v1680_v43, %v1034_v28 }
 0x1e4   : > { %v1053_v32 = vmax.f32 %v1035_v29, 0.0 }
 0x1e9   : > { %v1036_v30 = vpop.f32.mrf.mxu2 }
 0x1ea   : > { %v1037_v31 = vadd.f32 %v1680_v43, %v1036_v30 }
 0x1ec   : > { %v1054_v33 = vmax.f32 %v1037_v31, 0.0 }
 0x1ee   : > { %v1062_v34 = vpack.c.bf16 %v1054_v33, %v1053_v32 }
 0x1f0   : > { %1174 = vmatmul.bf16.gmra.mxu3 %v1062_v34 }
 0x203   : > { %v1140_v36 = vpop.f32.mrf.mxu3 }
 0x204   : > { %v1141_v37 = vadd.f32 %v1681_v35, %v1140_v36 }
 0x206   : > { %1180 = vst [vmem:[%s2195_s29] sm:$0xff] %v1141_v37 }
 0x20b   : > { %v1142_v38 = vpop.f32.mrf.mxu3 }
 0x20c   : > { %v1143_v39 = vadd.f32 %v1681_v35, %v1142_v38 }
 0x20e   : > { %1181 = vst [vmem:[%s2195_s29 + $0x8] sm:$0xff] %v1143_v39 }
 0x213   : > { %v1145_v40 = vpop.f32.mrf.mxu3 }
 0x214   : > { %v1146_v41 = vadd.f32 %v1681_v35, %v1145_v40 }
 0x216   : > { %1182 = vst [vmem:[%s2195_s29 + $0x10] sm:$0xff] %v1146_v41 }
 0x21b   : > { %v1147_v42 = vpop.f32.mrf.mxu3 }
 0x21c   : > { %v1148_v43 = vadd.f32 %v1681_v35, %v1147_v42 }
 0x21e   : > { %1183 = vst [vmem:[%s2195_s29 + $0x18] sm:$0xff] %v1148_v43 }
 0x223   : > { %v1150_v44 = vpop.f32.mrf.mxu3 }
 0x224   : > { %v1151_v45 = vadd.f32 %v1681_v35, %v1150_v44 }
 0x226   : > { %1184 = vst [vmem:[%s2195_s29 + $0x20] sm:$0xff] %v1151_v45 }
 0x22b   : > { %v1152_v46 = vpop.f32.mrf.mxu3 }
 0x22c   : > { %v1153_v53 = vadd.f32 %v1681_v35, %v1152_v46 }
 0x22e   : > { %1185 = vst [vmem:[%s2195_s29 + $0x28] sm:$0xff] %v1153_v53 }
 0x233   : > { %v1155_v47 = vpop.f32.mrf.mxu3 }
 0x234   : > { %v1156_v48 = vadd.f32 %v1681_v35, %v1155_v47 }
 0x236   : > { %1186 = vst [vmem:[%s2195_s29 + $0x30] sm:$0xff] %v1156_v48 }
 0x23b   : > { %v1157_v49 = vpop.f32.mrf.mxu3 }
 0x23c   : > { %v1158_v50 = vadd.f32 %v1681_v35, %v1157_v49 }
 0x23e   : > { %1187 = vst [vmem:[%s2195_s29 + $0x38] sm:$0xff] %v1158_v50 }
 0x243   : > { %v1160_v51 = vpop.f32.mrf.mxu3 }
 0x244   : > { %v1161_v52 = vadd.f32 %v1681_v35, %v1160_v51 }
 0x246   : > { %1188 = vst [vmem:[%s2195_s29 + $0x40] sm:$0xff] %v1161_v52 }
 0x24b   : > { %v1162_v54 = vpop.f32.mrf.mxu3 }
 0x24c   : > { %v1163_v55 = vadd.f32 %v1681_v35, %v1162_v54 }
 0x24e   : > { %1189 = vst [vmem:[%s2195_s29 + $0x48] sm:$0xff] %v1163_v55 }
 0x253   : > { %v1165_v56 = vpop.f32.mrf.mxu3 }
 0x254   : > { %v1166_v57 = vadd.f32 %v1681_v35, %v1165_v56 }
 0x256   : > { %1190 = vst [vmem:[%s2195_s29 + $0x50] sm:$0xff] %v1166_v57 }
 0x25b   : > { %v1167_v58 = vpop.f32.mrf.mxu3 }
 0x25c   : > { %v1168_v59 = vadd.f32 %v1681_v35, %v1167_v58 }
 0x25e   : > { %1191 = vst [vmem:[%s2195_s29 + $0x58] sm:$0xff] %v1168_v59 }
 0x263   : > { %v1170_v60 = vpop.f32.mrf.mxu3 }
 0x264   : > { %v1171_v61 = vadd.f32 %v1681_v35, %v1170_v60 }
 0x266   : > { %1192 = vst [vmem:[%s2195_s29 + $0x60] sm:$0xff] %v1171_v61 }
 0x26b   : > { %v1172_v62 = vpop.f32.mrf.mxu3 }
 0x26c   : > { %v1173_v63 = vadd.f32 %v1681_v35, %v1172_v62 }
 0x26e   : > { %1193 = vst [vmem:[%s2195_s29 + $0x68] sm:$0xff] %v1173_v63 }
 0x273   : > { %v1175_v0 = vpop.f32.mrf.mxu3 }
 0x274   : > { %v1176_v1 = vadd.f32 %v1681_v35, %v1175_v0 }
 0x276   : > { %1194 = vst [vmem:[%s2195_s29 + $0x70] sm:$0xff] %v1176_v1 }
 0x27b   : > { %v1177_v2 = vpop.f32.mrf.mxu3 }
 0x27c   : > { %v1178_v3 = vadd.f32 %v1681_v35, %v1177_v2 }
 0x27e   : > { %1195 = vst [vmem:[%s2195_s29 + $0x78] sm:$0xff] %v1178_v3 }
 0x27f   : > { %1859 = shalt.err (!%p1856_p0)
}
 0x280   : > { %s1939_s9 = smov 128   ;;  %s1940_s11 = smov 8  }
 0x281   : > { %1592 = dma.vmem_to_hbm [thread:$0]  (%p2073_p5), %s1210_s8, 2048, %s1212_s15, %s1197_s20, %s1939_s9, %s1939_s9, %s1940_s11  }
 0x282 PF: > { %s2294_s0 = sld [smem:[#allocation20_spill]]  ;;  %p1612_p3 = pnand %p1353_p11, %p2034_p6 }
 0x284   : > { %p1613_p7 = pneg %p1612_p3 }
 0x288   : > { %s1226_s19 = sand.u32 1, %s2294_s0  }
 0x289   : > { %s1227_s25 = scalar_lea.sflag [#allocation6], %s1226_s19 }
 0x28a   : > { %1905 = dma.done.wait (%p1613_p7), %s1227_s25, 2048  }
 0x28b   : > { %1907 = vsyncadd (%p1613_p7), %s1227_s25, 4294965248  ;;  %s27_s12 = sadd.s32 1, %s1930_s12   ;;  %s2296_s24 = sld [smem:[#allocation21_spill]] }
 0x28c   : > { %p24_p9 = scmp.ge.s32.totalorder %s27_s12, 4   ;;  %s2297_s9 = sld [smem:[#allocation25_spill]] }
 0x28d   : > { %s2298_s10 = sld [smem:[#allocation22_spill]]  ;;  %s2300_s29 = smov %s1914_s30 }
 0x28e   : > { %s2299_s11 = sld [smem:[#allocation24_spill]]  ;;  %26 = sbr.rel (!%p24_p9) target bundleno = 14 (0xe), region = 129 }
 0x291   : > { %s2301_s30 = smov %s2296_s24 }
 0x293   :  { %1233 = vsyncpa [#allocation5], 1 }
 0x294   :  { %1235 = vsyncpa [#allocation5 + $0x1], 1 }
 0x295   :  { %1236 = vsyncpa [#allocation8], 1 }
 0x296   :  { %1237 = vsyncpa [#allocation12], 1 }
 0x297   :  { %1238 = vsyncpa [#allocation6], 1 }
 0x298   :  { %1240 = vsyncpa [#allocation6 + $0x1], 1 }

</bundles_post_ra>
